<compile_context>
chip_gen: v6e
topology: v6e:2x2x1
jax: 0.10.0
libtpu: 0.0.40
codegen_flags: <defaults>
</compile_context>

<pallas_src>
import jax
import jax.numpy as jnp
from jax.experimental import pallas as pl
from jax.experimental.pallas import tpu as pltpu


def _round_up(x, m):
    return ((x + m - 1) // m) * m


def mlp_kernel(x_ref, w1_ref, b1_ref, w2_ref, b2_ref, w3_ref, b3_ref, o_ref):
    # x arrives f32 straight from HBM; cast to bf16 on the VPU (kernel is DMA-bound,
    # so this is free and avoids a separate XLA cast pass over x).
    x = x_ref[...].astype(jnp.bfloat16)
    # Layer 1: Linear (bf16 MXU, f32 accumulation) + bias + ReLU.
    h1 = jnp.dot(x, w1_ref[...], preferred_element_type=jnp.float32)
    h1 = jnp.maximum(h1 + b1_ref[...], 0.0).astype(jnp.bfloat16)
    # Layer 2: Linear + bias + ReLU.
    h2 = jnp.dot(h1, w2_ref[...], preferred_element_type=jnp.float32)
    h2 = jnp.maximum(h2 + b2_ref[...], 0.0).astype(jnp.bfloat16)
    # Layer 3: Linear + bias (no activation). Narrow (10-lane) f32 store; the
    # kernel has ample store-slot slack, so no lane padding is used.
    o_ref[...] = (
        jnp.dot(h2, w3_ref[...], preferred_element_type=jnp.float32) + b3_ref[...]
    )


def prepare_params(w1, b1, w2, b2, w3, b3):
    """One-time parameter prep (do this at init, outside the hot path).

    Casts weights to bf16 and reshapes 1-D biases to [1, out_dim] (f32).
    Weights are expected in [in_dim, out_dim] layout (transposed vs. nn.Linear).
    """
    def _bias(b):
        return jnp.asarray(b, jnp.float32).reshape(1, -1)

    return (
        jnp.asarray(w1, jnp.bfloat16), _bias(b1),
        jnp.asarray(w2, jnp.bfloat16), _bias(b2),
        jnp.asarray(w3, jnp.bfloat16), _bias(b3),
    )


def _pick_batch_tile(batch):
    if batch <= 512:
        # Single (sublane-aligned) tile; grid = (1,).
        return _round_up(batch, 8)
    # Large batch: big tiles amortize the ~0.35 us per-grid-step overhead, but keep
    # at least 2 grid steps so the "parallel" axis can shard across megacore TCs.
    return min(1024, _round_up((batch + 1) // 2, 8))


def neural_net_forward(x, params):
    """Pallas forward pass of the 3-layer MLP.

    x: [batch, input_dim] f32.
    params: output of `prepare_params` (bf16 weights [in, out], f32 biases [1, out]).
    Returns [batch, 10] f32 logits.
    """
    w1, b1, w2, b2, w3, b3 = params
    batch, input_dim = x.shape
    l1, l2, out_dim = w1.shape[1], w2.shape[1], w3.shape[1]

    tb = _pick_batch_tile(batch)
    grid = (pl.cdiv(batch, tb),)

    flops = 2 * batch * (input_dim * l1 + l1 * l2 + l2 * out_dim)
    bytes_accessed = (
        4 * x.size                              # f32 activations, read once
        + 2 * (w1.size + w2.size + w3.size)     # bf16 weights (VMEM-resident)
        + 4 * (b1.size + b2.size + b3.size)     # f32 biases
        + 4 * batch * out_dim                   # f32 logits
    )

    return pl.pallas_call(
        mlp_kernel,
        out_shape=jax.ShapeDtypeStruct((batch, out_dim), jnp.float32),
        grid=grid,
        in_specs=[
            # x/out tiles march over the batch; weights/biases map to block (0, 0)
            # every step so they stay VMEM-resident across the whole grid.
            pl.BlockSpec((tb, input_dim), lambda i: (i, 0)),
            pl.BlockSpec((input_dim, l1), lambda i: (0, 0)),
            pl.BlockSpec((1, l1), lambda i: (0, 0)),
            pl.BlockSpec((l1, l2), lambda i: (0, 0)),
            pl.BlockSpec((1, l2), lambda i: (0, 0)),
            pl.BlockSpec((l2, out_dim), lambda i: (0, 0)),
            pl.BlockSpec((1, out_dim), lambda i: (0, 0)),
        ],
        out_specs=pl.BlockSpec((tb, out_dim), lambda i: (i, 0)),
        compiler_params=pltpu.CompilerParams(
            dimension_semantics=("parallel",),
        ),
        cost_estimate=pl.CostEstimate(
            flops=flops, transcendentals=0, bytes_accessed=bytes_accessed
        ),
    )(x, w1, b1, w2, b2, w3, b3)


def init_linear_params(key, in_dim, out_dim):
    """PyTorch-style init: U(-1/sqrt(fan_in), 1/sqrt(fan_in)).

    Weight returned in [in_dim, out_dim] layout (transposed vs. nn.Linear);
    bias is 1-D [out_dim] as in nn.Linear.
    """
    kw, kb = jax.random.split(key)
    bound = 1.0 / jnp.sqrt(jnp.float32(in_dim))
    w = jax.random.uniform(kw, (in_dim, out_dim), jnp.float32, -bound, bound)
    b = jax.random.uniform(kb, (out_dim,), jnp.float32, -bound, bound)
    return w, b


def _ref_bf16_policy(x, w1, b1, w2, b2, w3, b3):
    """Pure-JAX reference mirroring the kernel's precision policy."""
    h1 = jnp.maximum(
        jnp.dot(x.astype(jnp.bfloat16), w1.astype(jnp.bfloat16),
                preferred_element_type=jnp.float32) + b1, 0.0
    ).astype(jnp.bfloat16)
    h2 = jnp.maximum(
        jnp.dot(h1, w2.astype(jnp.bfloat16),
                preferred_element_type=jnp.float32) + b2, 0.0
    ).astype(jnp.bfloat16)
    return jnp.dot(h2, w3.astype(jnp.bfloat16),
                   preferred_element_type=jnp.float32) + b3


if __name__ == "__main__":
    # Shapes from the module: input_dim=784, layer1=128, layer2=64, out=10.
    input_dim, layer1_dim, layer2_dim, out_dim = 784, 128, 64, 10

    key = jax.random.PRNGKey(0)
    kx, k1, k2, k3, kx2 = jax.random.split(key, 5)

    w1, b1 = init_linear_params(k1, input_dim, layer1_dim)
    w2, b2 = init_linear_params(k2, layer1_dim, layer2_dim)
    w3, b3 = init_linear_params(k3, layer2_dim, out_dim)
    params = prepare_params(w1, b1, w2, b2, w3, b3)   # one-time, outside hot path

    # --- Small batch (grid of 1) ---
    batch = 8
    x = jax.random.normal(kx, (batch, input_dim), jnp.float32)
    out = jax.block_until_ready(neural_net_forward(x, params))
    assert out.shape == (batch, out_dim)

    ref = _ref_bf16_policy(x, w1, b1, w2, b2, w3, b3)
    assert jnp.allclose(out, ref, atol=2e-3, rtol=2e-3)

    # Loose check vs. full-f32 reference (bf16 matmul inputs is a deliberate policy).
    h1f = jnp.maximum(x @ w1 + b1, 0.0)
    h2f = jnp.maximum(h1f @ w2 + b2, 0.0)
    reff = h2f @ w3 + b3
    assert jnp.allclose(out, reff, atol=5e-2, rtol=5e-2)

    # --- Ragged multi-tile batch (exercises non-divisible grid + masked writeback) ---
    batch2 = 777
    x2 = jax.random.normal(kx2, (batch2, input_dim), jnp.float32)
    out2 = jax.block_until_ready(neural_net_forward(x2, params))
    assert out2.shape == (batch2, out_dim)
    ref2 = _ref_bf16_policy(x2, w1, b1, w2, b2, w3, b3)
    assert jnp.allclose(out2, ref2, atol=2e-3, rtol=2e-3)

    print("KERNEL_OK")
</pallas_src>

<mosaic_0001>
module attributes {stable_mosaic.version = 11 : i64} {
  func.func @mlp_kernel(%arg0: i32, %arg1: memref<8x784xf32, #tpu.memory_space<vmem>>, %arg2: memref<784x128xbf16, #tpu.memory_space<vmem>>, %arg3: memref<1x128xf32, #tpu.memory_space<vmem>>, %arg4: memref<128x64xbf16, #tpu.memory_space<vmem>>, %arg5: memref<1x64xf32, #tpu.memory_space<vmem>>, %arg6: memref<64x10xbf16, #tpu.memory_space<vmem>>, %arg7: memref<1x10xf32, #tpu.memory_space<vmem>>, %arg8: memref<8x10xf32, #tpu.memory_space<vmem>>) attributes {dimension_semantics = [#tpu.dimension_semantics<parallel>], iteration_bounds = array<i64: 1>, scalar_prefetch = 0 : i64, scratch_operands = 0 : i64, tpu.core_type = #tpu.core_type<tc>, window_params = [{transform_indices = @transform_0, window_bounds = array<i64: 8, 784>}, {pipeline_mode = #tpu.pipeline_mode<synchronous>, transform_indices = @transform_1, window_bounds = array<i64: 784, 128>}, {pipeline_mode = #tpu.pipeline_mode<synchronous>, transform_indices = @transform_2, window_bounds = array<i64: 1, 128>}, {pipeline_mode = #tpu.pipeline_mode<synchronous>, transform_indices = @transform_3, window_bounds = array<i64: 128, 64>}, {pipeline_mode = #tpu.pipeline_mode<synchronous>, transform_indices = @transform_4, window_bounds = array<i64: 1, 64>}, {pipeline_mode = #tpu.pipeline_mode<synchronous>, transform_indices = @transform_5, window_bounds = array<i64: 64, 10>}, {pipeline_mode = #tpu.pipeline_mode<synchronous>, transform_indices = @transform_6, window_bounds = array<i64: 1, 10>}, {transform_indices = @transform_7, window_bounds = array<i64: 8, 10>}]} {
    %c0 = arith.constant 0 : index
    %c0_0 = arith.constant 0 : index
    %0 = vector.load %arg1[%c0, %c0_0] : memref<8x784xf32, #tpu.memory_space<vmem>>, vector<8x784xf32>
    %1 = arith.truncf %0 : vector<8x784xf32> to vector<8x784xbf16>
    %c0_1 = arith.constant 0 : index
    %c0_2 = arith.constant 0 : index
    %2 = vector.load %arg2[%c0_1, %c0_2] : memref<784x128xbf16, #tpu.memory_space<vmem>>, vector<784x128xbf16>
    %cst = arith.constant dense<0.000000e+00> : vector<8x128xf32>
    %3 = tpu.matmul %1, %2, %cst {dimension_numbers = #tpu.dot_dimension_numbers<[1], [0], [0], [1], [0, 0, 1, 1], [], []>} : vector<8x784xbf16>, vector<784x128xbf16>, vector<8x128xf32> -> vector<8x128xf32>
    %c0_3 = arith.constant 0 : index
    %c0_4 = arith.constant 0 : index
    %4 = vector.load %arg3[%c0_3, %c0_4] : memref<1x128xf32, #tpu.memory_space<vmem>>, vector<1x128xf32>
    %5 = vector.broadcast %4 : vector<1x128xf32> to vector<8x128xf32>
    %6 = arith.addf %3, %5 : vector<8x128xf32>
    %cst_5 = arith.constant 0.000000e+00 : f32
    %7 = vector.broadcast %cst_5 : f32 to vector<8x128xf32>
    %8 = arith.maximumf %6, %7 : vector<8x128xf32>
    %9 = arith.truncf %8 : vector<8x128xf32> to vector<8x128xbf16>
    %c0_6 = arith.constant 0 : index
    %c0_7 = arith.constant 0 : index
    %10 = vector.load %arg4[%c0_6, %c0_7] : memref<128x64xbf16, #tpu.memory_space<vmem>>, vector<128x64xbf16>
    %cst_8 = arith.constant dense<0.000000e+00> : vector<8x64xf32>
    %11 = tpu.matmul %9, %10, %cst_8 {dimension_numbers = #tpu.dot_dimension_numbers<[1], [0], [0], [1], [0, 0, 1, 1], [], []>} : vector<8x128xbf16>, vector<128x64xbf16>, vector<8x64xf32> -> vector<8x64xf32>
    %c0_9 = arith.constant 0 : index
    %c0_10 = arith.constant 0 : index
    %12 = vector.load %arg5[%c0_9, %c0_10] : memref<1x64xf32, #tpu.memory_space<vmem>>, vector<1x64xf32>
    %13 = vector.broadcast %12 : vector<1x64xf32> to vector<8x64xf32>
    %14 = arith.addf %11, %13 : vector<8x64xf32>
    %cst_11 = arith.constant 0.000000e+00 : f32
    %15 = vector.broadcast %cst_11 : f32 to vector<8x64xf32>
    %16 = arith.maximumf %14, %15 : vector<8x64xf32>
    %17 = arith.truncf %16 : vector<8x64xf32> to vector<8x64xbf16>
    %c0_12 = arith.constant 0 : index
    %c0_13 = arith.constant 0 : index
    %18 = vector.load %arg6[%c0_12, %c0_13] : memref<64x10xbf16, #tpu.memory_space<vmem>>, vector<64x10xbf16>
    %cst_14 = arith.constant dense<0.000000e+00> : vector<8x10xf32>
    %19 = tpu.matmul %17, %18, %cst_14 {dimension_numbers = #tpu.dot_dimension_numbers<[1], [0], [0], [1], [0, 0, 1, 1], [], []>} : vector<8x64xbf16>, vector<64x10xbf16>, vector<8x10xf32> -> vector<8x10xf32>
    %c0_15 = arith.constant 0 : index
    %c0_16 = arith.constant 0 : index
    %20 = vector.load %arg7[%c0_15, %c0_16] : memref<1x10xf32, #tpu.memory_space<vmem>>, vector<1x10xf32>
    %21 = vector.broadcast %20 : vector<1x10xf32> to vector<8x10xf32>
    %22 = arith.addf %19, %21 : vector<8x10xf32>
    %c0_17 = arith.constant 0 : index
    %c0_18 = arith.constant 0 : index
    %23 = vector.load %arg8[%c0_17, %c0_18] : memref<8x10xf32, #tpu.memory_space<vmem>>, vector<8x10xf32>
    tpu.vector_store %arg8[%c0_17, %c0_18], %22 {strides = array<i32>} : memref<8x10xf32, #tpu.memory_space<vmem>>, vector<8x10xf32>,
    return
  }
  func.func @transform_0(%arg0: i32) -> (i32, i32) {
    %c0_i32 = arith.constant 0 : i32
    %c0_i32_0 = arith.constant 0 : i32
    return %arg0, %c0_i32 : i32, i32
  }
  func.func @transform_1(%arg0: i32) -> (i32, i32) {
    %c0_i32 = arith.constant 0 : i32
    %c0_i32_0 = arith.constant 0 : i32
    %c0_i32_1 = arith.constant 0 : i32
    return %c0_i32, %c0_i32_0 : i32, i32
  }
  func.func @transform_2(%arg0: i32) -> (i32, i32) {
    %c0_i32 = arith.constant 0 : i32
    %c0_i32_0 = arith.constant 0 : i32
    %c0_i32_1 = arith.constant 0 : i32
    return %c0_i32, %c0_i32_0 : i32, i32
  }
  func.func @transform_3(%arg0: i32) -> (i32, i32) {
    %c0_i32 = arith.constant 0 : i32
    %c0_i32_0 = arith.constant 0 : i32
    %c0_i32_1 = arith.constant 0 : i32
    return %c0_i32, %c0_i32_0 : i32, i32
  }
  func.func @transform_4(%arg0: i32) -> (i32, i32) {
    %c0_i32 = arith.constant 0 : i32
    %c0_i32_0 = arith.constant 0 : i32
    %c0_i32_1 = arith.constant 0 : i32
    return %c0_i32, %c0_i32_0 : i32, i32
  }
  func.func @transform_5(%arg0: i32) -> (i32, i32) {
    %c0_i32 = arith.constant 0 : i32
    %c0_i32_0 = arith.constant 0 : i32
    %c0_i32_1 = arith.constant 0 : i32
    return %c0_i32, %c0_i32_0 : i32, i32
  }
  func.func @transform_6(%arg0: i32) -> (i32, i32) {
    %c0_i32 = arith.constant 0 : i32
    %c0_i32_0 = arith.constant 0 : i32
    %c0_i32_1 = arith.constant 0 : i32
    return %c0_i32, %c0_i32_0 : i32, i32
  }
  func.func @transform_7(%arg0: i32) -> (i32, i32) {
    %c0_i32 = arith.constant 0 : i32
    %c0_i32_0 = arith.constant 0 : i32
    return %arg0, %c0_i32 : i32, i32
  }
}

</mosaic_0001>

<bundles_post_ra>
// kernel: tpu_custom_call.1
= control target key start
LH: loop header
LB: loop body
LE: loop exit
PB: predicated region body
PF: predicated region fallthrough
CT: control target
= control target key end

     0   :  { %12 = vsyncpa [#allocation3], 0  ;;  %s1268_s0 = inlined_call_operand.vmem [shape: f32[8,784], index: 0, kind: input, shape index: {}]   ;;  %s1269_s1 = inlined_call_operand.hbm [shape: bf16[784,128], index: 1, kind: input, shape index: {}]   ;;  %s1270_s2 = inlined_call_operand.vmem [shape: f32[1,128], index: 2, kind: input, shape index: {}]   ;;  %s1271_s3 = inlined_call_operand.vmem [shape: bf16[128,64], index: 3, kind: input, shape index: {}]   ;;  %s1272_s4 = inlined_call_operand.vmem [shape: f32[1,64], index: 4, kind: input, shape index: {}]   ;;  %s1273_s5 = inlined_call_operand.vmem [shape: bf16[64,10], index: 5, kind: input, shape index: {}]   ;;  %s1274_s6 = inlined_call_operand.vmem [shape: f32[1,10], index: 6, kind: input, shape index: {}]   ;;  %s1275_s7 = inlined_call_operand.hbm [shape: f32[8,10], index: 7, kind: output, shape index: {}]  }
   0x1   :  { %13 = vsyncpa [#allocation4], 0  ;;  %s1131_s24 = smov [#allocation2]  }
   0x2   :  { %s21_s25 = sshll.u32 %s1131_s24, 4  ;;  %s22_s25 = int_to_ptr.vmem [resolvable:$true] %s21_s25 }
   0x3   :  { %s1095_s26 = scalar_lea.vmem %s22_s25, 6272  ;;  %p1100_p1 = scmp.lt.s32.totalorder %s22_s25, %s22_s25 }
   0x4   :  { %p1096_p0 = scmp.ne.s32.totalorder %s22_s25, %s1095_s26  ;;  %p1101_p2 = scmp.lt.s32.totalorder %s1095_s26, %s1095_s26 }
   0x6   :  { %p1102_p3 = por %p1101_p2, %p1100_p1 }
   0x8   :  { %p1103_p4 = pnand %p1102_p3, %p1096_p0 }
   0xa   :  { %1106 = shalt.err (!%p1103_p4)
}
   0xb   :  { %s1132_s27 = smov 64   ;;  %s1133_s28 = smov 4  }
   0xc   :  { %27 = dma.hbm_to_vmem [thread:$0]  %s1269_s1, 6272, %s22_s25, [#allocation3], %s1132_s27, %s1132_s27, %s1133_s28  }
   0xd   :  { %1127 = dma.done.wait [#allocation3], 6272  }
   0xe   :  { %1128 = vsyncadd [#allocation3], 4294961024  ;;  %v1026_v0 = vld [vmem:[#allocation2 + $0x78] sm:$0xff]   ;;  %v1030_v4 = vld [vmem:[#allocation2 + $0x70] sm:$0xff]   ;;  %v1134_v44 = vmov 0.0   ;;  %vm1135_vm0 = vmmov 0  }
   0xf   :  { %v1027_v1 = vld [vmem:[#allocation2 + $0x38] sm:$0xff]   ;;  %900 = vmatprep.subr.bf16.mxu0 %v1026_v0  ;;  %v1031_v5 = vld [vmem:[#allocation2 + $0x30] sm:$0xff]   ;;  %v1034_v8 = vld [vmem:[#allocation2 + $0x68] sm:$0xff]   ;;  %vm455_vm1 = vcmask 130048   ;;  %vm773_vm2 = vcmask 523264   ;;  %s1136_s24 = smov [#allocation5]  }
  0x10   :  { %v1028_v2 = vld [vmem:[#allocation2 + $0xf8] sm:$0xff]   ;;  %901 = vmatpush3.bf16.msra.mxu0 %v1027_v1  ;;  %v1032_v6 = vld [vmem:[#allocation2 + $0xf0] sm:$0xff]   ;;  %v1035_v9 = vld [vmem:[#allocation2 + $0x28] sm:$0xff]   ;;  %vm817_vm3 = vcmask 80896  }
  0x11   :  { %v1029_v3 = vld [vmem:[#allocation2 + $0xb8] sm:$0xff]   ;;  %922 = vmatprep.subr.bf16.mxu1 %v1028_v2  ;;  %902 = vmatprep.subr.bf16.mxu0 %v1030_v4  ;;  %v1033_v7 = vld [vmem:[#allocation2 + $0xb0] sm:$0xff]   ;;  %v1036_v10 = vld [vmem:[#allocation2 + $0xe8] sm:$0xff]  }
  0x12   :  { %923 = vmatpush3.bf16.msra.mxu1 %v1029_v3  ;;  %v1037_v11 = vld [vmem:[#allocation2 + $0xa8] sm:$0xff]   ;;  %v1038_v12 = vld [vmem:[#allocation2 + $0x60] sm:$0xff]   ;;  %v1042_v16 = vld [vmem:[#allocation2 + $0x58] sm:$0xff]  }
  0x13   :  { %924 = vmatprep.subr.bf16.mxu1 %v1032_v6  ;;  %v1039_v13 = vld [vmem:[#allocation2 + $0x20] sm:$0xff]   ;;  %v1043_v17 = vld [vmem:[#allocation2 + $0x18] sm:$0xff]   ;;  %v1046_v20 = vld [vmem:[#allocation2 + $0x50] sm:$0xff]  }
  0x14   :  { %903 = vmatpush3.bf16.msra.mxu0 %v1031_v5  ;;  %v1040_v14 = vld [vmem:[#allocation2 + $0xe0] sm:$0xff]   ;;  %v1044_v18 = vld [vmem:[#allocation2 + $0xd8] sm:$0xff]   ;;  %v1047_v21 = vld [vmem:[#allocation2 + $0x10] sm:$0xff]  }
  0x15   :  { %904 = vmatprep.subr.bf16.mxu0 %v1034_v8  ;;  %v1041_v15 = vld [vmem:[#allocation2 + $0xa0] sm:$0xff]   ;;  %v1045_v19 = vld [vmem:[#allocation2 + $0x98] sm:$0xff]   ;;  %v1048_v22 = vld [vmem:[#allocation2 + $0xd0] sm:$0xff]  }
  0x16   :  { %925 = vmatpush3.bf16.msra.mxu1 %v1033_v7  ;;  %v1049_v23 = vld [vmem:[#allocation2 + $0x90] sm:$0xff]   ;;  %v1050_v24 = vld [vmem:[#allocation2 + $0x48] sm:$0xff]   ;;  %v1054_v28 = vld [vmem:[#allocation2 + $0x40] sm:$0xff]  }
  0x17   :  { %926 = vmatprep.subr.bf16.mxu1 %v1036_v10  ;;  %v1051_v25 = vld [vmem:[#allocation2 + $0x8] sm:$0xff]   ;;  %v1055_v29 = vld [vmem:[#allocation2] sm:$0xff]   ;;  %v1058_v36 = vld [vmem:[#allocation2 + $0x178] sm:$0xff]  }
  0x18   :  { %905 = vmatpush3.bf16.msra.mxu0 %v1035_v9  ;;  %v1052_v26 = vld [vmem:[#allocation2 + $0xc8] sm:$0xff]   ;;  %v1056_v30 = vld [vmem:[#allocation2 + $0xc0] sm:$0xff]   ;;  %v45_v37 = vld [vmem:[%s1268_s0 + $0x18] sm:$0xff] }
  0x19   :  { %906 = vmatprep.subr.bf16.mxu0 %v1038_v12  ;;  %v1053_v27 = vld [vmem:[#allocation2 + $0x88] sm:$0xff]   ;;  %v1057_v33 = vld [vmem:[#allocation2 + $0x80] sm:$0xff]   ;;  %v52_v38 = vpack.c.bf16 %v45_v37, %v45_v37  ;;  %v1059_v39 = vld [vmem:[#allocation2 + $0x138] sm:$0xff]  }
  0x1a   :  { %927 = vmatpush3.bf16.msra.mxu1 %v1037_v11  ;;  %v43_v31 = vld [vmem:[%s1268_s0 + $0x8] sm:$0xff]  ;;  %v42_v34 = vld [vmem:[%s1268_s0] sm:$0xff]  ;;  %v44_v40 = vld [vmem:[%s1268_s0 + $0x10] sm:$0xff] }
  0x1b   :  { %928 = vmatprep.subr.bf16.mxu1 %v1040_v14  ;;  %v50_v32 = vpack.c.bf16 %v43_v31, %v43_v31  ;;  %v49_v35 = vpack.c.bf16 %v42_v34, %v42_v34  ;;  %531 = vmatprep.mubr.bf16.mxu1 %v52_v38  ;;  %v51_v41 = vpack.c.bf16 %v44_v40, %v44_v40  ;;  %v1060_v42 = vld [vmem:[#allocation2 + $0x170] sm:$0xff]   ;;  %v1062_v45 = vld [vmem:[#allocation2 + $0x168] sm:$0xff]   ;;  %v1064_v47 = vld [vmem:[#allocation2 + $0x160] sm:$0xff]  }
  0x1c   :  { %907 = vmatpush3.bf16.msra.mxu0 %v1039_v13  ;;  %v1061_v43 = vld [vmem:[#allocation2 + $0x130] sm:$0xff]   ;;  %v1063_v46 = vld [vmem:[#allocation2 + $0x128] sm:$0xff]   ;;  %v1065_v48 = vld [vmem:[#allocation2 + $0x120] sm:$0xff]  }
  0x1d   :  { %908 = vmatprep.subr.bf16.mxu0 %v1042_v16  ;;  %491 = vmatprep.mubr.bf16.mxu0 %v50_v32  ;;  %v1066_v49 = vld [vmem:[#allocation2 + $0x158] sm:$0xff]   ;;  %v1068_v51 = vld [vmem:[#allocation2 + $0x150] sm:$0xff]   ;;  %v1074_v53 = vld [vmem:[#allocation2 + $0x180] sm:$0xff]  }
  0x1e   :  { %929 = vmatpush3.bf16.msra.mxu1 %v1041_v15  ;;  %v1067_v50 = vld [vmem:[#allocation2 + $0x118] sm:$0xff]   ;;  %v1069_v52 = vld [vmem:[#allocation2 + $0x110] sm:$0xff]   ;;  %v47_v54 = vld [vmem:[%s1268_s0 + $0x28] sm:$0xff] }
  0x1f   :  { %930 = vmatprep.subr.bf16.mxu1 %v1044_v18  ;;  %v1070_v55 = vld [vmem:[#allocation2 + $0x148] sm:$0xff]   ;;  %v54_v56 = vpack.c.bf16 %v47_v54, %v47_v54  ;;  %v48_v57 = vld [vmem:[%s1268_s0 + $0x30] sm:$0xff]  ;;  %v1072_v60 = vld [vmem:[#allocation2 + $0x140] sm:$0xff]  }
  0x20   :  { %909 = vmatpush3.bf16.msra.mxu0 %v1043_v17  ;;  %v55_v58 = vpack.c.bf16 %v48_v57, %v48_v57  ;;  %v1071_v59 = vld [vmem:[#allocation2 + $0x108] sm:$0xff]   ;;  %v1073_v61 = vld [vmem:[#allocation2 + $0x100] sm:$0xff]   ;;  %v1075_v0 = vld [vmem:[%s1271_s3 + $0x38] sm:$0xff]  }
  0x21   :  { %910 = vmatprep.subr.bf16.mxu0 %v1046_v20  ;;  %v46_v62 = vld [vmem:[%s1268_s0 + $0x20] sm:$0xff]  ;;  %v1076_v1 = vld [vmem:[%s1271_s3 + $0x30] sm:$0xff]   ;;  %v1077_v2 = vld [vmem:[%s1271_s3 + $0x28] sm:$0xff]  }
  0x22   :  { %931 = vmatpush3.bf16.msra.mxu1 %v1045_v19  ;;  %v53_v63 = vpack.c.bf16 %v46_v62, %v46_v62  ;;  %v1078_v3 = vld [vmem:[%s1271_s3 + $0x20] sm:$0xff]   ;;  %v1079_v4 = vld [vmem:[%s1271_s3 + $0x18] sm:$0xff]   ;;  %v1080_v5 = vld [vmem:[%s1271_s3 + $0x10] sm:$0xff]  }
  0x23   :  { %932 = vmatprep.subr.bf16.mxu1 %v1048_v22  ;;  %v1081_v6 = vld [vmem:[%s1271_s3 + $0x8] sm:$0xff]   ;;  %v1082_v7 = vld [vmem:[%s1271_s3] sm:$0xff]   ;;  %v1083_v8 = vld [vmem:[%s1273_s5 + $0x18] sm:$0xff]  }
  0x24   :  { %911 = vmatpush3.bf16.msra.mxu0 %v1047_v21  ;;  %v1084_v9 = vld [vmem:[%s1273_s5 + $0x10] sm:$0xff]   ;;  %v1086_v37 = vld [vmem:[%s1273_s5] sm:$0xff]  }
  0x25   :  { %912 = vmatprep.subr.bf16.mxu0 %v1050_v24  ;;  %v885_v38 = vld [vmem:[%s1272_s4] ss:$0 sm:$0xff] }
  0x26   :  { %933 = vmatpush3.bf16.msra.mxu1 %v1049_v23  ;;  %v834_v23 = vld [vmem:[%s1270_s2] ss:$0 sm:$0xff] }
  0x27   :  { %934 = vmatprep.subr.bf16.mxu1 %v1052_v26 }
  0x28   :  { %913 = vmatpush3.bf16.msra.mxu0 %v1051_v25 }
  0x29   :  { %914 = vmatprep.subr.bf16.mxu0 %v1054_v28 }
  0x2a   :  { %935 = vmatpush3.bf16.msra.mxu1 %v1053_v27 }
  0x2b   :  { %936 = vmatprep.subr.bf16.mxu1 %v1056_v30 }
  0x2c   :  { %915 = vmatpush3.bf16.msra.mxu0 %v1055_v29 }
  0x2d   :  { %944 = vmatprep.subr.bf16.mxu0 %v1058_v36  ;;  %v1085_v36 = vld [vmem:[%s1273_s5 + $0x8] sm:$0xff]   ;;  %s825_s5 = sshll.u32 %s1136_s24, 4  ;;  %s826_s5 = int_to_ptr.vmem [resolvable:$true] %s825_s5 }
  0x2e   :  { %937 = vmatpush3.bf16.msra.mxu1 %v1057_v33  ;;  %s1107_s4 = scalar_lea.vmem %s826_s5, 128  ;;  %p1112_p6 = scmp.lt.s32.totalorder %s826_s5, %s826_s5 }
  0x2f   :  { %492 = vmatmul.mubr.bf16.vlgmr.msra.gmra.mxu0 %v49_v35  ;;  %982 = vmatprep.subr.bf16.mxu1 %v1134_v44  ;;  %p1108_p5 = scmp.ne.s32.totalorder %s826_s5, %s1107_s4  ;;  %p1113_p7 = scmp.lt.s32.totalorder %s1107_s4, %s1107_s4 }
  0x30   :  { %945 = vmatpush3.bf16.msra.mxu0 %v1059_v39  ;;  %571 = vmatprep.mubr.bf16.mxu0 %v54_v56 }
  0x31   :  { %532 = vmatmul.mubr.bf16.vlgmr.msra.gmra.mxu1 %v51_v41  ;;  %946 = vmatprep.subr.bf16.mxu0 %v1060_v42  ;;  %p1114_p8 = por %p1113_p7, %p1112_p6 }
  0x32   :  { %984 = vmatprep.mubr.msk.bf16.mxu1 %vm1135_vm0, %v1134_v44  ;;  %983 = vmatpush3.bf16.msra.mxu1 %v1074_v53 }
  0x33   :  { %988 = vmatprep.subr.bf16.mxu1 %v1134_v44  ;;  %p1115_p9 = pnand %p1114_p8, %p1108_p5 }
  0x34   :  { %947 = vmatpush3.bf16.msra.mxu0 %v1061_v43 }
  0x35   :  { %948 = vmatprep.subr.bf16.mxu0 %v1062_v45 }
  0x38   :  { %949 = vmatpush3.bf16.msra.mxu0 %v1063_v46 }
  0x39   :  { %950 = vmatprep.subr.bf16.mxu0 %v1064_v47  ;;  %985 = vmatmul.mubr.msk.bf16.vlgmr.msra.gmra.mxu1 %vm455_vm1, %v55_v58 }
  0x3a   :  { %1004 = vmatprep.mubr.msk.bf16.mxu1 %vm1135_vm0, %v1134_v44  ;;  %989 = vmatpush3.bf16.msra.mxu1 %v1075_v0 }
  0x3b   :  { %990 = vmatprep.subr.bf16.mxu1 %v1134_v44 }
  0x3c   :  { %951 = vmatpush3.bf16.msra.mxu0 %v1065_v48 }
  0x3d   :  { %952 = vmatprep.subr.bf16.mxu0 %v1066_v49 }
  0x3e   :  { %991 = vmatpush3.bf16.msra.mxu1 %v1076_v1 }
  0x3f   :  { %992 = vmatprep.subr.bf16.mxu1 %v1134_v44 }
  0x40   :  { %953 = vmatpush3.bf16.msra.mxu0 %v1067_v50 }
  0x41   :  { %954 = vmatprep.subr.bf16.mxu0 %v1068_v51 }
  0x42   :  { %993 = vmatpush3.bf16.msra.mxu1 %v1077_v2 }
  0x43   :  { %994 = vmatprep.subr.bf16.mxu1 %v1134_v44 }
  0x44   :  { %955 = vmatpush3.bf16.msra.mxu0 %v1069_v52 }
  0x45   :  { %956 = vmatprep.subr.bf16.mxu0 %v1070_v55 }
  0x46   :  { %995 = vmatpush3.bf16.msra.mxu1 %v1078_v3 }
  0x47   :  { %996 = vmatprep.subr.bf16.mxu1 %v1134_v44 }
  0x48   :  { %957 = vmatpush3.bf16.msra.mxu0 %v1071_v59 }
  0x49   :  { %958 = vmatprep.subr.bf16.mxu0 %v1072_v60 }
  0x4a   :  { %997 = vmatpush3.bf16.msra.mxu1 %v1079_v4 }
  0x4b   :  { %998 = vmatprep.subr.bf16.mxu1 %v1134_v44 }
  0x4c   :  { %959 = vmatpush3.bf16.msra.mxu0 %v1073_v61 }
  0x4d   :  { %1008 = vmatprep.subr.bf16.mxu0 %v1134_v44 }
  0x4e   :  { %999 = vmatpush3.bf16.msra.mxu1 %v1080_v5 }
  0x4f   :  { %572 = vmatmul.mubr.bf16.vlgmr.msra.gmra.mxu0 %v53_v63  ;;  %1000 = vmatprep.subr.bf16.mxu1 %v1134_v44 }
  0x50   :  { %1016 = vmatprep.mubr.msk.bf16.mxu0 %vm1135_vm0, %v1134_v44  ;;  %1009 = vmatpush3.bf16.msra.mxu0 %v1083_v8 }
  0x51   :  { %1010 = vmatprep.subr.bf16.mxu0 %v1134_v44 }
  0x52   :  { %1001 = vmatpush3.bf16.msra.mxu1 %v1081_v6 }
  0x53   :  { %1002 = vmatprep.subr.bf16.mxu1 %v1134_v44 }
  0x54   :  { %1011 = vmatpush3.bf16.msra.mxu0 %v1084_v9 }
  0x55   :  { %1012 = vmatprep.subr.bf16.mxu0 %v1134_v44 }
  0x56   :  { %1003 = vmatpush3.bf16.msra.mxu1 %v1082_v7 }
  0x58   :  { %1013 = vmatpush3.bf16.msra.mxu0 %v1085_v36 }
  0x59   :  { %1014 = vmatprep.subr.bf16.mxu0 %v1134_v44  ;;  %v894_v44 = vld [vmem:[%s1274_s6] ss:$0 sm:$0xff] }
  0x5c   :  { %1015 = vmatpush3.bf16.msra.mxu0 %v1086_v37 }
  0xef   :  { %v916_v10 = vpop.f32.mrf.mxu0 }
  0xf1   :  { %v917_v11 = vpop.f32.mrf.mxu0  ;;  %v938_v12 = vpop.f32.mrf.mxu1 }
  0xf2   :  { %v918_v22 = vadd.f32 %v917_v11, %v916_v10 }
  0xf3   :  { %v919_v13 = vpop.f32.mrf.mxu0  ;;  %v939_v14 = vpop.f32.mrf.mxu1 }
  0xf4   :  { %v494_v24 = vadd.f32 %v918_v22, %v834_v23  ;;  %v940_v25 = vadd.f32 %v939_v14, %v938_v12 }
  0xf5   :  { %v920_v15 = vpop.f32.mrf.mxu0  ;;  %v941_v16 = vpop.f32.mrf.mxu1 }
  0xf6   :  { %v534_v28 = vadd.f32 %v940_v25, %v494_v24 }
  0xf7   :  { %v942_v17 = vpop.f32.mrf.mxu1 }
  0xf9   :  { %v613_v18 = vpop.f32.mrf.mxu1 }
  0xfb   :  { %v986_v19 = vpop.f32.mrf.mxu1 }
  0xfd   :  { %v616_v20 = vpop.f32.mrf.mxu1 }
  0xff   :  { %v987_v21 = vpop.f32.mrf.mxu1 }
 0x10f   :  { %v960_v26 = vpop.f32.mrf.mxu0 }
 0x111   :  { %v961_v27 = vpop.f32.mrf.mxu0 }
 0x112   :  { %v962_v29 = vadd.f32 %v961_v27, %v960_v26 }
 0x113   :  { %v963_v30 = vpop.f32.mrf.mxu0 }
 0x114   :  { %v574_v31 = vadd.f32 %v962_v29, %v534_v28 }
 0x115   :  { %v964_v32 = vpop.f32.mrf.mxu0 }
 0x116   :  { %v614_v33 = vadd.f32 %v613_v18, %v574_v31 }
 0x118   :  { %v619_v34 = vmax.f32 %v614_v33, 0.0 }
 0x11a   :  { %v620_v35 = vpack.c.bf16 %v619_v34, %v619_v34 }
 0x11c   :  { %1005 = vmatmul.mubr.bf16.vlgmr.msra.gmra.mxu1 %v620_v35 }
 0x1dc   :  { %v726_v39 = vpop.f32.mrf.mxu1 }
 0x1dd   :  { %v727_v40 = vadd.f32 %v885_v38, %v726_v39 }
 0x1de   :  { %v1006_v41 = vpop.f32.mrf.mxu1 }
 0x1df   :  { %v732_v42 = vmax.f32 %v727_v40, 0.0 }
 0x1e0   :  { %v729_v43 = vpop.f32.mrf.mxu1 }
 0x1e1   :  { %v733_v45 = vpack.c.bf16 %v732_v42, %v732_v42 }
 0x1e2   :  { %v1007_v46 = vpop.f32.mrf.mxu1 }
 0x1e3   :  { %1017 = vmatmul.mubr.msk.bf16.vlgmr.msra.gmra.mxu0 %vm773_vm2, %v733_v45 }
 0x2a3   :  { %v811_v47 = vpop.f32.mrf.mxu0 }
 0x2a4   :  { %v812_v48 = vadd.f32 %v894_v44, %v811_v47 }
 0x2a5   :  { %v1018_v49 = vpop.f32.mrf.mxu0 }
 0x2a6   :  { %818 = vst.msk [vmem:[#allocation5] sm:$0xff] %vm817_vm3, %v812_v48 }
 0x2a7   :  { %v814_v50 = vpop.f32.mrf.mxu0 }
 0x2a8   :  { %1118 = shalt.err (!%p1115_p9)
}
 0x2a9   :  { %828 = dma.vmem_to_hbm [thread:$0]  %s826_s5, 128, %s1275_s7, [#allocation4]   ;;  %v1019_v51 = vpop.f32.mrf.mxu0 }
 0x2aa   :  { %1129 = dma.done.wait [#allocation4], 128  }
 0x2ab   :  { %1130 = vsyncadd [#allocation4], 4294967168 }
 0x2ac   :  { %832 = vsyncpa [#allocation3], 1 }
 0x2ad   :  { %833 = vsyncpa [#allocation4], 1 }

</bundles_post_ra>
